<compile_context>
chip_gen: v5e
topology: v5e:2x2
jax: 0.10.0
libtpu: 0.0.40
codegen_flags: <defaults>
</compile_context>

<pallas_src>
import jax
import jax.numpy as jnp
from jax.experimental import pallas as pl
from jax.experimental.pallas import tpu as pltpu


def mlp_kernel(x_ref,
               w1_ref, b1_ref,
               w2_ref, b2_ref,
               w3_ref, b3_ref,
               w4_ref, b4_ref,
               o_ref):
    # x tile arrives row-major (tile_b, 20); go feature-major once, up front.
    h = x_ref[...].T                                                   # (20, tile_b) f32

    h = jnp.dot(w1_ref[...], h, preferred_element_type=jnp.float32) + b1_ref[...]
    h = jnp.maximum(h, 0.0)                                            # (64, tile_b)

    h = jnp.dot(w2_ref[...], h, preferred_element_type=jnp.float32) + b2_ref[...]
    h = jnp.maximum(h, 0.0)                                            # (32, tile_b)

    h = jnp.dot(w3_ref[...], h, preferred_element_type=jnp.float32) + b3_ref[...]
    h = jnp.maximum(h, 0.0)                                            # (16, tile_b)

    h = jnp.dot(w4_ref[...], h, preferred_element_type=jnp.float32) + b4_ref[...]

    o_ref[...] = h.astype(o_ref.dtype)                                 # (5, tile_b) lane-dense store


def _round_up(a, m):
    return (a + m - 1) // m * m


def sequential_model(x, params, tile_b=4096):
    """x: (B, 20) float32.
    params: PyTorch-native layouts — w{i}: (out, in) f32, b{i}: (out, 1) f32.
    Returns (B, 5) float32."""
    B, f_in = x.shape
    assert f_in == 20, f_in

    if B <= 128:
        tb = B                                    # single full-array block
    else:
        # Multiple of 128 (lane-dense output block, full vregs per sublane),
        # capped so the grid has >= 2 steps (keeps both v7x TCs busy and the
        # pipeline overlapped).
        tb = _round_up(min(tile_b, 8192), 128)
        tb = min(tb, _round_up(pl.cdiv(B, 2), 128))
        tb = max(tb, 128)
    grid = (pl.cdiv(B, tb),)

    w1, w2, w3, w4 = params["w1"], params["w2"], params["w3"], params["w4"]
    b1, b2, b3, b4 = params["b1"], params["b2"], params["b3"], params["b4"]

    # Grid-invariant blocks: constant index_map => weights/biases stay resident
    # in VMEM and are not re-DMA'd per step (total < 10 KiB).
    const = lambda a: pl.BlockSpec(a.shape, lambda i: (0, 0))

    out_fm = pl.pallas_call(
        mlp_kernel,
        out_shape=jax.ShapeDtypeStruct((5, B), x.dtype),
        grid=grid,
        in_specs=[pl.BlockSpec((tb, 20), lambda i: (i, 0)),
                  const(w1), const(b1),
                  const(w2), const(b2),
                  const(w3), const(b3),
                  const(w4), const(b4)],
        out_specs=pl.BlockSpec((5, tb), lambda i: (0, i)),
        compiler_params=pltpu.CompilerParams(
            dimension_semantics=("parallel",)),
    )(x, w1, b1, w2, b2, w3, b3, w4, b4)

    # Only the tiny 5-wide output is transposed back to the module's (B, 5).
    return out_fm.T


def init_params(key):
    """Deterministic init mimicking PyTorch nn.Linear default
    (U[-1/sqrt(fan_in), +1/sqrt(fan_in)]), stored in PyTorch-native layout:
    weight (out_features, in_features), bias (out_features, 1)."""
    dims = [(20, 64), (64, 32), (32, 16), (16, 5)]
    params = {}
    for i, (fan_in, fan_out) in enumerate(dims, start=1):
        key, kw, kb = jax.random.split(key, 3)
        bound = 1.0 / (fan_in ** 0.5)
        params[f"w{i}"] = jax.random.uniform(
            kw, (fan_out, fan_in), jnp.float32, -bound, bound)
        params[f"b{i}"] = jax.random.uniform(
            kb, (fan_out, 1), jnp.float32, -bound, bound)
    return params


def reference(x, params):
    """Plain-JAX reference of the PyTorch forward pass (row-major, f32)."""
    h = x
    for i in range(1, 5):
        h = jnp.dot(h, params[f"w{i}"].T) + params[f"b{i}"][:, 0]
        if i < 4:
            h = jnp.maximum(h, 0.0)
    return h


if __name__ == "__main__":
    key = jax.random.PRNGKey(0)
    key, kx1, kx2, kx3 = jax.random.split(key, 4)
    params = init_params(key)

    # Single-block path (B <= 128).
    B1 = 8
    x1 = jax.random.normal(kx1, (B1, 20), jnp.float32)
    out1 = jax.block_until_ready(sequential_model(x1, params))
    ref1 = reference(x1, params)
    assert out1.shape == (B1, 5), out1.shape
    assert jnp.allclose(out1, ref1, atol=5e-3, rtol=5e-3), "mismatch vs reference (B=8)"

    # Ragged batch: tb=256, grid=2 (both v7x TCs), last block overhangs by 212 rows.
    B2 = 300
    x2 = jax.random.normal(kx2, (B2, 20), jnp.float32)
    out2 = jax.block_until_ready(sequential_model(x2, params))
    ref2 = reference(x2, params)
    assert out2.shape == (B2, 5), out2.shape
    assert jnp.allclose(out2, ref2, atol=5e-3, rtol=5e-3), "mismatch vs reference (B=300)"

    # Larger ragged batch with an explicit smaller tile: grid of 4 steps.
    B3 = 1000
    x3 = jax.random.normal(kx3, (B3, 20), jnp.float32)
    out3 = jax.block_until_ready(sequential_model(x3, params, tile_b=256))
    ref3 = reference(x3, params)
    assert out3.shape == (B3, 5), out3.shape
    assert jnp.allclose(out3, ref3, atol=5e-3, rtol=5e-3), "mismatch vs reference (B=1000)"

    print("KERNEL_OK")
</pallas_src>

<mosaic_0001>
module attributes {stable_mosaic.version = 11 : i64} {
  func.func @mlp_kernel(%arg0: i32, %arg1: memref<8x20xf32, #tpu.memory_space<vmem>>, %arg2: memref<64x20xf32, #tpu.memory_space<vmem>>, %arg3: memref<64x1xf32, #tpu.memory_space<vmem>>, %arg4: memref<32x64xf32, #tpu.memory_space<vmem>>, %arg5: memref<32x1xf32, #tpu.memory_space<vmem>>, %arg6: memref<16x32xf32, #tpu.memory_space<vmem>>, %arg7: memref<16x1xf32, #tpu.memory_space<vmem>>, %arg8: memref<5x16xf32, #tpu.memory_space<vmem>>, %arg9: memref<5x1xf32, #tpu.memory_space<vmem>>, %arg10: memref<5x8xf32, #tpu.memory_space<vmem>>) attributes {dimension_semantics = [#tpu.dimension_semantics<parallel>], iteration_bounds = array<i64: 1>, scalar_prefetch = 0 : i64, scratch_operands = 0 : i64, tpu.core_type = #tpu.core_type<tc>, window_params = [{transform_indices = @transform_0, window_bounds = array<i64: 8, 20>}, {pipeline_mode = #tpu.pipeline_mode<synchronous>, transform_indices = @transform_1, window_bounds = array<i64: 64, 20>}, {pipeline_mode = #tpu.pipeline_mode<synchronous>, transform_indices = @transform_2, window_bounds = array<i64: 64, 1>}, {pipeline_mode = #tpu.pipeline_mode<synchronous>, transform_indices = @transform_3, window_bounds = array<i64: 32, 64>}, {pipeline_mode = #tpu.pipeline_mode<synchronous>, transform_indices = @transform_4, window_bounds = array<i64: 32, 1>}, {pipeline_mode = #tpu.pipeline_mode<synchronous>, transform_indices = @transform_5, window_bounds = array<i64: 16, 32>}, {pipeline_mode = #tpu.pipeline_mode<synchronous>, transform_indices = @transform_6, window_bounds = array<i64: 16, 1>}, {pipeline_mode = #tpu.pipeline_mode<synchronous>, transform_indices = @transform_7, window_bounds = array<i64: 5, 16>}, {pipeline_mode = #tpu.pipeline_mode<synchronous>, transform_indices = @transform_8, window_bounds = array<i64: 5, 1>}, {transform_indices = @transform_9, window_bounds = array<i64: 5, 8>}]} {
    %c0 = arith.constant 0 : index
    %c0_0 = arith.constant 0 : index
    %0 = vector.load %arg1[%c0, %c0_0] : memref<8x20xf32, #tpu.memory_space<vmem>>, vector<8x20xf32>
    %1 = tpu.transpose %0, [1, 0] : vector<8x20xf32> -> vector<20x8xf32>
    %c0_1 = arith.constant 0 : index
    %c0_2 = arith.constant 0 : index
    %2 = vector.load %arg2[%c0_1, %c0_2] : memref<64x20xf32, #tpu.memory_space<vmem>>, vector<64x20xf32>
    %cst = arith.constant dense<0.000000e+00> : vector<64x8xf32>
    %3 = tpu.matmul %2, %1, %cst {dimension_numbers = #tpu.dot_dimension_numbers<[1], [0], [0], [1], [0, 0, 1, 1], [], []>} : vector<64x20xf32>, vector<20x8xf32>, vector<64x8xf32> -> vector<64x8xf32>
    %c0_3 = arith.constant 0 : index
    %c0_4 = arith.constant 0 : index
    %4 = vector.load %arg3[%c0_3, %c0_4] : memref<64x1xf32, #tpu.memory_space<vmem>>, vector<64x1xf32>
    %5 = vector.broadcast %4 : vector<64x1xf32> to vector<64x8xf32>
    %6 = arith.addf %3, %5 : vector<64x8xf32>
    %cst_5 = arith.constant 0.000000e+00 : f32
    %7 = vector.broadcast %cst_5 : f32 to vector<64x8xf32>
    %8 = arith.maximumf %6, %7 : vector<64x8xf32>
    %c0_6 = arith.constant 0 : index
    %c0_7 = arith.constant 0 : index
    %9 = vector.load %arg4[%c0_6, %c0_7] : memref<32x64xf32, #tpu.memory_space<vmem>>, vector<32x64xf32>
    %cst_8 = arith.constant dense<0.000000e+00> : vector<32x8xf32>
    %10 = tpu.matmul %9, %8, %cst_8 {dimension_numbers = #tpu.dot_dimension_numbers<[1], [0], [0], [1], [0, 0, 1, 1], [], []>} : vector<32x64xf32>, vector<64x8xf32>, vector<32x8xf32> -> vector<32x8xf32>
    %c0_9 = arith.constant 0 : index
    %c0_10 = arith.constant 0 : index
    %11 = vector.load %arg5[%c0_9, %c0_10] : memref<32x1xf32, #tpu.memory_space<vmem>>, vector<32x1xf32>
    %12 = vector.broadcast %11 : vector<32x1xf32> to vector<32x8xf32>
    %13 = arith.addf %10, %12 : vector<32x8xf32>
    %cst_11 = arith.constant 0.000000e+00 : f32
    %14 = vector.broadcast %cst_11 : f32 to vector<32x8xf32>
    %15 = arith.maximumf %13, %14 : vector<32x8xf32>
    %c0_12 = arith.constant 0 : index
    %c0_13 = arith.constant 0 : index
    %16 = vector.load %arg6[%c0_12, %c0_13] : memref<16x32xf32, #tpu.memory_space<vmem>>, vector<16x32xf32>
    %cst_14 = arith.constant dense<0.000000e+00> : vector<16x8xf32>
    %17 = tpu.matmul %16, %15, %cst_14 {dimension_numbers = #tpu.dot_dimension_numbers<[1], [0], [0], [1], [0, 0, 1, 1], [], []>} : vector<16x32xf32>, vector<32x8xf32>, vector<16x8xf32> -> vector<16x8xf32>
    %c0_15 = arith.constant 0 : index
    %c0_16 = arith.constant 0 : index
    %18 = vector.load %arg7[%c0_15, %c0_16] : memref<16x1xf32, #tpu.memory_space<vmem>>, vector<16x1xf32>
    %19 = vector.broadcast %18 : vector<16x1xf32> to vector<16x8xf32>
    %20 = arith.addf %17, %19 : vector<16x8xf32>
    %cst_17 = arith.constant 0.000000e+00 : f32
    %21 = vector.broadcast %cst_17 : f32 to vector<16x8xf32>
    %22 = arith.maximumf %20, %21 : vector<16x8xf32>
    %c0_18 = arith.constant 0 : index
    %c0_19 = arith.constant 0 : index
    %23 = vector.load %arg8[%c0_18, %c0_19] : memref<5x16xf32, #tpu.memory_space<vmem>>, vector<5x16xf32>
    %cst_20 = arith.constant dense<0.000000e+00> : vector<5x8xf32>
    %24 = tpu.matmul %23, %22, %cst_20 {dimension_numbers = #tpu.dot_dimension_numbers<[1], [0], [0], [1], [0, 0, 1, 1], [], []>} : vector<5x16xf32>, vector<16x8xf32>, vector<5x8xf32> -> vector<5x8xf32>
    %c0_21 = arith.constant 0 : index
    %c0_22 = arith.constant 0 : index
    %25 = vector.load %arg9[%c0_21, %c0_22] : memref<5x1xf32, #tpu.memory_space<vmem>>, vector<5x1xf32>
    %26 = vector.broadcast %25 : vector<5x1xf32> to vector<5x8xf32>
    %27 = arith.addf %24, %26 : vector<5x8xf32>
    %c0_23 = arith.constant 0 : index
    %c0_24 = arith.constant 0 : index
    %28 = vector.load %arg10[%c0_23, %c0_24] : memref<5x8xf32, #tpu.memory_space<vmem>>, vector<5x8xf32>
    tpu.vector_store %arg10[%c0_23, %c0_24], %27 {strides = array<i32>} : memref<5x8xf32, #tpu.memory_space<vmem>>, vector<5x8xf32>,
    return
  }
  func.func @transform_0(%arg0: i32) -> (i32, i32) {
    %c0_i32 = arith.constant 0 : i32
    %c0_i32_0 = arith.constant 0 : i32
    return %arg0, %c0_i32 : i32, i32
  }
  func.func @transform_1(%arg0: i32) -> (i32, i32) {
    %c0_i32 = arith.constant 0 : i32
    %c0_i32_0 = arith.constant 0 : i32
    %c0_i32_1 = arith.constant 0 : i32
    return %c0_i32, %c0_i32_0 : i32, i32
  }
  func.func @transform_2(%arg0: i32) -> (i32, i32) {
    %c0_i32 = arith.constant 0 : i32
    %c0_i32_0 = arith.constant 0 : i32
    %c0_i32_1 = arith.constant 0 : i32
    return %c0_i32, %c0_i32_0 : i32, i32
  }
  func.func @transform_3(%arg0: i32) -> (i32, i32) {
    %c0_i32 = arith.constant 0 : i32
    %c0_i32_0 = arith.constant 0 : i32
    %c0_i32_1 = arith.constant 0 : i32
    return %c0_i32, %c0_i32_0 : i32, i32
  }
  func.func @transform_4(%arg0: i32) -> (i32, i32) {
    %c0_i32 = arith.constant 0 : i32
    %c0_i32_0 = arith.constant 0 : i32
    %c0_i32_1 = arith.constant 0 : i32
    return %c0_i32, %c0_i32_0 : i32, i32
  }
  func.func @transform_5(%arg0: i32) -> (i32, i32) {
    %c0_i32 = arith.constant 0 : i32
    %c0_i32_0 = arith.constant 0 : i32
    %c0_i32_1 = arith.constant 0 : i32
    return %c0_i32, %c0_i32_0 : i32, i32
  }
  func.func @transform_6(%arg0: i32) -> (i32, i32) {
    %c0_i32 = arith.constant 0 : i32
    %c0_i32_0 = arith.constant 0 : i32
    %c0_i32_1 = arith.constant 0 : i32
    return %c0_i32, %c0_i32_0 : i32, i32
  }
  func.func @transform_7(%arg0: i32) -> (i32, i32) {
    %c0_i32 = arith.constant 0 : i32
    %c0_i32_0 = arith.constant 0 : i32
    %c0_i32_1 = arith.constant 0 : i32
    return %c0_i32, %c0_i32_0 : i32, i32
  }
  func.func @transform_8(%arg0: i32) -> (i32, i32) {
    %c0_i32 = arith.constant 0 : i32
    %c0_i32_0 = arith.constant 0 : i32
    %c0_i32_1 = arith.constant 0 : i32
    return %c0_i32, %c0_i32_0 : i32, i32
  }
  func.func @transform_9(%arg0: i32) -> (i32, i32) {
    %c0_i32 = arith.constant 0 : i32
    %c0_i32_0 = arith.constant 0 : i32
    return %c0_i32, %arg0 : i32, i32
  }
}

</mosaic_0001>

<bundles_post_ra>
// kernel: tpu_custom_call.1
= control target key start
LH: loop header
LB: loop body
LE: loop exit
PB: predicated region body
PF: predicated region fallthrough
CT: control target
= control target key end

     0   :  { %vm90_vm0 = vcmask 162816   ;;  %v392_v3 = vmov 0   ;;  %s550_s0 = inlined_call_operand.vmem [shape: f32[8,20], index: 0, kind: input, shape index: {}]   ;;  %s551_s1 = inlined_call_operand.vmem [shape: f32[64,20], index: 1, kind: input, shape index: {}]   ;;  %s552_s2 = inlined_call_operand.vmem [shape: f32[64,1], index: 2, kind: input, shape index: {}]   ;;  %s553_s3 = inlined_call_operand.vmem [shape: f32[32,64], index: 3, kind: input, shape index: {}]   ;;  %s554_s4 = inlined_call_operand.vmem [shape: f32[32,1], index: 4, kind: input, shape index: {}]   ;;  %s555_s5 = inlined_call_operand.vmem [shape: f32[16,32], index: 5, kind: input, shape index: {}]   ;;  %s556_s6 = inlined_call_operand.vmem [shape: f32[16,1], index: 6, kind: input, shape index: {}]   ;;  %s557_s7 = inlined_call_operand.vmem [shape: f32[5,16], index: 7, kind: input, shape index: {}]   ;;  %s558_s8 = inlined_call_operand.vmem [shape: f32[5,1], index: 8, kind: input, shape index: {}]   ;;  %s559_s9 = inlined_call_operand.hbm [shape: f32[5,8], index: 9, kind: output, shape index: {}]  }
   0x1   :  { %v33_v0 = vld [vmem:[%s550_s0] sm:$0xff]  ;;  %v47_v1 = vld [vmem:[%s552_s2 + $0x28] sm:$0xff]  ;;  %v49_v2 = vld [vmem:[%s552_s2 + $0x38] sm:$0xff]  ;;  %364 = vset.pattern.permute.xlu1 %v392_v3  ;;  %363 = vset.pattern.permute.xlu0 %v392_v3 }
   0x2   :  { %336 = vmatpush.xpose.msk.msra.mxu0 %vm90_vm0, %v33_v0  ;;  %v34_v4 = vld [vmem:[%s551_s1] sm:$0xff]  ;;  %352 = vmatpush.xpose.msk.msra.mxu3 %vm90_vm0, %v33_v0  ;;  %v39_v5 = vld [vmem:[%s551_s1 + $0x28] sm:$0xff]  ;;  %v45_v6 = vld [vmem:[%s552_s2 + $0x18] sm:$0xff] }
   0x3   :  { %77 = vperm.xlu1 %364, %v47_v1   ;;  %87 = vperm.xlu0 %363, %v49_v2   ;;  %v46_v7 = vld [vmem:[%s552_s2 + $0x20] sm:$0xff]  ;;  %v48_v8 = vld [vmem:[%s552_s2 + $0x30] sm:$0xff] }
   0x4   :  { %365 = vset.pattern.permute.xlu2 %v392_v3 }
   0x5   :  { %337 = vmatmul.msk.f32.vlgmr.msra.gmra.mxu0 %vm90_vm0, %v34_v4  ;;  %342 = vmatmul.msk.f32.vlgmr.msra.gmra.mxu3 %vm90_vm0, %v39_v5 }
   0x6   :  { %67 = vperm.xlu2 %365, %v45_v6  }
   0x7   :  { %14 = vsyncpa [#allocation3], 0  ;;  %v35_v9 = vld [vmem:[%s551_s1 + $0x8] sm:$0xff]  ;;  %v40_v10 = vld [vmem:[%s551_s1 + $0x30] sm:$0xff]  ;;  %vm195_vm1 = vcmask 523264   ;;  %vm255_vm2 = vcmask 261120  }
   0x8   :  { %v44_v11 = vld [vmem:[%s552_s2 + $0x10] sm:$0xff]  ;;  %v42_v12 = vld [vmem:[%s552_s2] sm:$0xff]  ;;  %v43_v13 = vld [vmem:[%s552_s2 + $0x8] sm:$0xff]  ;;  %vm294_vm3 = vcmask 130048   ;;  %s393_s19 = smov [#allocation2]   ;;  %s327_s22 = sshll.u32 %s559_s9, 4  ;;  %s328_s22 = int_to_ptr.hbm [resolvable:$true] %s327_s22 }
   0x9   :  { %v36_v14 = vld [vmem:[%s551_s1 + $0x10] sm:$0xff]  ;;  %v41_v15 = vld [vmem:[%s551_s1 + $0x38] sm:$0xff]  ;;  %v172_v18 = vld [vmem:[%s554_s4 + $0x8] sm:$0xff]  ;;  %s325_s20 = sshll.u32 %s393_s19, 4  ;;  %vm318_vm4 = vcmask 61440   ;;  %s326_s20 = int_to_ptr.vmem [resolvable:$true] %s325_s20 }
   0xa   :  { %v174_v16 = vld [vmem:[%s554_s4 + $0x18] sm:$0xff]  ;;  %v173_v17 = vld [vmem:[%s554_s4 + $0x10] sm:$0xff]  ;;  %v171_v20 = vld [vmem:[%s554_s4] sm:$0xff] }
   0xb   :  { %72 = vperm.xlu1 %364, %v46_v7   ;;  %82 = vperm.xlu0 %363, %v48_v8   ;;  %v37_v19 = vld [vmem:[%s551_s1 + $0x18] sm:$0xff]  ;;  %v244_v21 = vld [vmem:[%s556_s6 + $0x8] sm:$0xff]  ;;  %v243_v22 = vld [vmem:[%s556_s6] sm:$0xff] }
   0xc   :  { %v38_v23 = vld [vmem:[%s551_s1 + $0x20] sm:$0xff]  ;;  %v170_v58 = vld [vmem:[%s553_s3 + $0x18] sm:$0xff]  ;;  %v168_v59 = vld [vmem:[%s553_s3 + $0x8] sm:$0xff] }
   0xd   :  { %338 = vmatmul.msk.f32.gmra.mxu0 %vm90_vm0, %v35_v9  ;;  %343 = vmatmul.msk.f32.gmra.mxu3 %vm90_vm0, %v40_v10  ;;  %v288_v24 = vld [vmem:[%s558_s8] sm:$0x1f]  ;;  %v169_v60 = vld [vmem:[%s553_s3 + $0x10] sm:$0xff] }
   0xe   :  { %62 = vperm.xlu2 %365, %v44_v11   ;;  %v167_v57 = vld [vmem:[%s553_s3] sm:$0xff] }
  0x13   :  { %52 = vperm.xlu1 %364, %v42_v12   ;;  %57 = vperm.xlu0 %363, %v43_v13   ;;  %v241_v13 = vld [vmem:[%s555_s5] sm:$0xff] }
  0x15   :  { %339 = vmatmul.msk.f32.gmra.mxu0 %vm90_vm0, %v36_v14  ;;  %344 = vmatmul.msk.f32.gmra.mxu3 %vm90_vm0, %v41_v15  ;;  %v242_v14 = vld [vmem:[%s555_s5 + $0x8] sm:$0xff] }
  0x16   :  { %192 = vperm.xlu2 %365, %v174_v16  }
  0x1b   :  { %187 = vperm.xlu0 %363, %v173_v17   ;;  %182 = vperm.xlu1 %364, %v172_v18  }
  0x1d   :  { %340 = vmatmul.msk.f32.gmra.mxu0 %vm90_vm0, %v37_v19 }
  0x1e   :  { %177 = vperm.xlu2 %365, %v171_v20  }
  0x23   :  { %252 = vperm.xlu0 %363, %v244_v21   ;;  %247 = vperm.xlu1 %364, %v243_v22  }
  0x25   :  { %341 = vmatmul.msk.f32.gmra.mxu0 %vm90_vm0, %v38_v23  ;;  %v287_v23 = vld [vmem:[%s557_s7] sm:$0x1f] }
  0x26   :  { %291 = vperm.xlu2 %365, %v288_v24  }
  0x60   :  { %v68_v34 = vpop.permute.xlu2 %67 }
  0x68   :  { %v63_v46 = vpop.permute.xlu2 %62 }
  0x70   :  { %v193_v62 = vpop.permute.xlu2 %192 }
  0x75   :  { %v88_v28 = vpop.permute.xlu0 %87  ;;  %v78_v30 = vpop.permute.xlu1 %77 }
  0x78   :  { %v178_v8 = vpop.permute.xlu2 %177 }
  0x7d   :  { %v83_v32 = vpop.permute.xlu0 %82  ;;  %v73_v38 = vpop.permute.xlu1 %72 }
  0x80   :  { %v292_v24 = vpop.permute.xlu2 %291 }
  0x82   :  { %v135_v25 = vpop.f32.mrf.mxu0 }
  0x85   :  { %v53_v49 = vpop.permute.xlu1 %52  ;;  %v58_v50 = vpop.permute.xlu0 %57 }
  0x86   :  { %v136_v53 = vadd.f32 %v135_v25, %v53_v49 }
  0x88   :  { %v150_v26 = vpop.f32.mrf.mxu3  ;;  %v159_v56 = vmax.f32 %v136_v53, 0.0 }
  0x89   :  { %v151_v39 = vadd.f32 %v150_v26, %v78_v30 }
  0x8a   :  { %v138_v27 = vpop.f32.mrf.mxu0 }
  0x8b   :  { %v164_v42 = vmax.f32 %v151_v39, 0.0  ;;  %v139_v51 = vadd.f32 %v138_v27, %v58_v50 }
  0x8d   :  { %v160_v55 = vmax.f32 %v139_v51, 0.0  ;;  %v188_v3 = vpop.permute.xlu0 %187  ;;  %v183_v4 = vpop.permute.xlu1 %182 }
  0x90   :  { %v153_v29 = vpop.f32.mrf.mxu3 }
  0x91   :  { %v154_v35 = vadd.f32 %v153_v29, %v83_v32 }
  0x92   :  { %v141_v31 = vpop.f32.mrf.mxu0 }
  0x93   :  { %v165_v41 = vmax.f32 %v154_v35, 0.0  ;;  %v142_v47 = vadd.f32 %v141_v31, %v63_v46 }
  0x95   :  { %v161_v54 = vmax.f32 %v142_v47, 0.0  ;;  %v253_v16 = vpop.permute.xlu0 %252  ;;  %v248_v17 = vpop.permute.xlu1 %247 }
  0x98   :  { %v156_v33 = vpop.f32.mrf.mxu3 }
  0x99   :  { %v157_v36 = vadd.f32 %v156_v33, %v88_v28 }
  0x9a   :  { %v144_v37 = vpop.f32.mrf.mxu0 }
  0x9b   :  { %v166_v40 = vmax.f32 %v157_v36, 0.0  ;;  %v145_v44 = vadd.f32 %v144_v37, %v68_v34 }
  0x9d   :  { %216 = vmatpush.msra.mxu1 %v166_v40  ;;  %353 = vmatpush.msra.mxu2 %v166_v40  ;;  %v162_v52 = vmax.f32 %v145_v44, 0.0 }
  0x9f   :  { %217 = vmatpush.msra.mxu1 %v165_v41  ;;  %354 = vmatpush.msra.mxu2 %v165_v41 }
  0xa1   :  { %218 = vmatpush.msra.mxu1 %v164_v42  ;;  %355 = vmatpush.msra.mxu2 %v164_v42 }
  0xa2   :  { %v147_v43 = vpop.f32.mrf.mxu0 }
  0xa3   :  { %v148_v45 = vadd.f32 %v147_v43, %v73_v38 }
  0xa5   :  { %v163_v48 = vmax.f32 %v148_v45, 0.0 }
  0xa7   :  { %219 = vmatpush.msra.mxu1 %v163_v48  ;;  %356 = vmatpush.msra.mxu2 %v163_v48 }
  0xa9   :  { %220 = vmatpush.msra.mxu1 %v162_v52  ;;  %357 = vmatpush.msra.mxu2 %v162_v52 }
  0xab   :  { %221 = vmatpush.msra.mxu1 %v161_v54  ;;  %358 = vmatpush.msra.mxu2 %v161_v54 }
  0xad   :  { %222 = vmatpush.msra.mxu1 %v160_v55  ;;  %359 = vmatpush.msra.mxu2 %v160_v55 }
  0xaf   :  { %223 = vmatpush.msra.mxu1 %v159_v56  ;;  %360 = vmatpush.msra.mxu2 %v159_v56 }
  0xb0   :  { %345 = vmatmul.msk.f32.vlgmr.msra.gmra.mxu1 %vm195_vm1, %v167_v57  ;;  %348 = vmatmul.msk.f32.vlgmr.msra.gmra.mxu2 %vm195_vm1, %v170_v58 }
  0xb8   :  { %346 = vmatmul.msk.f32.gmra.mxu1 %vm195_vm1, %v168_v59 }
  0xc0   :  { %347 = vmatmul.msk.f32.gmra.mxu1 %vm195_vm1, %v169_v60 }
 0x12d   :  { %v225_v61 = vpop.f32.mrf.mxu1 }
 0x12e   :  { %v226_v9 = vadd.f32 %v225_v61, %v178_v8 }
 0x130   :  { %v237_v12 = vmax.f32 %v226_v9, 0.0 }
 0x133   :  { %v234_v63 = vpop.f32.mrf.mxu2 }
 0x134   :  { %v235_v0 = vadd.f32 %v234_v63, %v193_v62 }
 0x135   :  { %v228_v1 = vpop.f32.mrf.mxu1 }
 0x136   :  { %v240_v2 = vmax.f32 %v235_v0, 0.0  ;;  %v229_v6 = vadd.f32 %v228_v1, %v183_v4 }
 0x138   :  { %274 = vmatpush.msrb.mxu2 %v240_v2  ;;  %v238_v11 = vmax.f32 %v229_v6, 0.0 }
 0x13d   :  { %v231_v5 = vpop.f32.mrf.mxu1 }
 0x13e   :  { %v232_v7 = vadd.f32 %v231_v5, %v188_v3 }
 0x140   :  { %v239_v10 = vmax.f32 %v232_v7, 0.0 }
 0x142   :  { %275 = vmatpush.msrb.mxu2 %v239_v10 }
 0x144   :  { %276 = vmatpush.msrb.mxu2 %v238_v11 }
 0x146   :  { %277 = vmatpush.msrb.mxu2 %v237_v12 }
 0x147   :  { %349 = vmatmul.msk.f32.vlgmr.msrb.gmra.mxu2 %vm255_vm2, %v241_v13 }
 0x14f   :  { %350 = vmatmul.msk.f32.gmra.mxu2 %vm255_vm2, %v242_v14 }
 0x1ca   :  { %v279_v15 = vpop.f32.mrf.mxu2 }
 0x1cb   :  { %v280_v19 = vadd.f32 %v279_v15, %v248_v17 }
 0x1cd   :  { %v285_v22 = vmax.f32 %v280_v19, 0.0 }
 0x1d2   :  { %v282_v18 = vpop.f32.mrf.mxu2 }
 0x1d3   :  { %v283_v20 = vadd.f32 %v282_v18, %v253_v16 }
 0x1d5   :  { %v286_v21 = vmax.f32 %v283_v20, 0.0 }
 0x1d7   :  { %312 = vmatpush.msrb.mxu3 %v286_v21 }
 0x1d9   :  { %313 = vmatpush.msrb.mxu3 %v285_v22 }
 0x1da   :  { %351 = vmatmul.msk.f32.vlgmr.msrb.gmra.mxu3 %vm294_vm3, %v287_v23 }
 0x25d   :  { %v315_v25 = vpop.f32.mrf.mxu3 }
 0x25e   :  { %v316_v26 = vadd.f32 %v315_v25, %v292_v24 }
 0x260   :  { %319 = vst.msk [vmem:[#allocation2] sm:$0x1f] %vm318_vm4, %v316_v26 }
 0x261   :  { %330 = dma.vmem_to_hbm [thread:$0]  %s326_s20, 128, %s328_s22, [#allocation3]  }
 0x262   :  { %390 = dma.done.wait [#allocation3], 128  }
 0x263   :  { %391 = vsyncadd [#allocation3], 4294967168 }
 0x264   :  { %335 = vsyncpa [#allocation3], 1 }

</bundles_post_ra>
